<compile_context>
chip_gen: v6e
topology: v6e:2x2x1
jax: 0.10.0
libtpu: 0.0.40
codegen_flags: <defaults>
</compile_context>

<pallas_src>
import functools

import jax
import jax.numpy as jnp
from jax.experimental import pallas as pl
from jax.experimental.pallas import tpu as pltpu


def _round_up(v, m):
    return ((v + m - 1) // m) * m


def _wce_focal_kernel(x_ref, lab_ref, w_ref,
                      ce_num_ref, w_den_ref, foc_ref,
                      acc_ce, acc_w, acc_foc, *, gamma, smooth):
    j = pl.program_id(1)                      # inner "arbitrary" (reduction) axis

    @pl.when(j == 0)
    def _init():
        acc_ce[...] = jnp.zeros_like(acc_ce)
        acc_w[...] = jnp.zeros_like(acc_w)
        acc_foc[...] = jnp.zeros_like(acc_foc)

    x = x_ref[...].astype(jnp.float32)                          # (B, C, T)
    lab = lab_ref[...].astype(jnp.float32).astype(jnp.int32)    # (B, 1, T)
    wn = w_ref[...].astype(jnp.float32)                         # (1, C, 1) sums to 1
    B, C, T = x.shape

    # fused softmax statistics over the class (sublane) axis
    x_max = jnp.max(x, axis=1, keepdims=True)                   # (B, 1, T)
    ex = jnp.exp(x - x_max)
    sum_ex = jnp.sum(ex, axis=1, keepdims=True)
    lse = jnp.log(sum_ex) + x_max                               # logsumexp

    # in-kernel one-hot (never materialized in HBM). Padded pixels carry the
    # out-of-range label id C -> onehot == 0 -> zero contribution, no masking.
    c_iota = jax.lax.broadcasted_iota(jnp.int32, (B, C, T), 1)
    onehot = (c_iota == lab).astype(jnp.float32)                # (B, C, T)

    x_t = jnp.sum(onehot * x, axis=1, keepdims=True)            # target logit
    w_t = jnp.sum(onehot * wn, axis=1, keepdims=True)           # normalized target weight

    ce = lse - x_t                                              # -log softmax[target]
    p_t = jnp.exp(x_t - lse)                                    # softmax prob of target

    s = smooth
    pt = (1.0 - s) * p_t + (s / (C - 1)) * (1.0 - p_t) + s
    logpt = jnp.log(pt)
    one_m_pt = 1.0 - pt
    if isinstance(gamma, int):
        focal_pow = one_m_pt * one_m_pt if gamma == 2 else one_m_pt ** gamma
    else:
        # float gamma keeps torch.pow's NaN hazard for (1 - pt) < 0 (pt can
        # exceed 1 by +smooth); the integer default (2) is safe.
        focal_pow = jnp.exp(gamma * jnp.log(one_m_pt))
    focal = -w_t * focal_pow * logpt

    # full-lane-width accumulators: pure VPU adds in the steady state; the only
    # cross-lane reduce runs once per core in the finalize below.
    acc_ce[...] += w_t * ce
    acc_w[...] += w_t
    acc_foc[...] += focal

    @pl.when(j == pl.num_programs(1) - 1)
    def _finalize():
        ce_num_ref[...] = jnp.full(ce_num_ref.shape, jnp.sum(acc_ce[...]), jnp.float32)
        w_den_ref[...] = jnp.full(w_den_ref.shape, jnp.sum(acc_w[...]), jnp.float32)
        foc_ref[...] = jnp.full(foc_ref.shape, jnp.sum(acc_foc[...]), jnp.float32)


def compound_wce_focal(logits, labels, weights, alpha, *, gamma=2, smooth=1e-05,
                       cast_logits_to_bf16=True, num_partials=2, tile_hw=None):
    """logits: (B, C, H, W) float. labels: (B, H, W) or (B, 1, H, W) int class
    ids. weights: (C,) class weights. alpha: scalar mix weight. Returns
    alpha * weighted_CE + (1 - alpha) * focal (scalar f32)."""
    B, C, H, W = logits.shape
    HW = H * W

    if labels.ndim == 4:                            # (B, 1, H, W) -> (B, H, W)
        labels = labels[:, 0]

    x = logits.reshape(B, C, HW)
    if cast_logits_to_bf16 and x.dtype == jnp.float32:
        # HBM-bound kernel: halving the dominant logits stream; math stays f32.
        x = x.astype(jnp.bfloat16)

    # labels in a 2-byte float container (exact for class ids <= 255): halves
    # the label DMA stream vs int32 on well-supported layouts.
    lab_dtype = jnp.bfloat16 if C <= 255 else jnp.float32
    lab = labels.astype(jnp.int32).reshape(B, 1, HW).astype(lab_dtype)

    w = jnp.asarray(weights).astype(jnp.float32)
    w_norm = (w / jnp.sum(w)).reshape(1, C, 1)      # hoisted normalization

    P = max(1, int(num_partials))                   # "parallel" axis -> 2 TCs on v7x

    x_b = jnp.dtype(x.dtype).itemsize
    l_b = jnp.dtype(lab_dtype).itemsize
    try:
        vmem_cap = int(pltpu.get_tpu_info().vmem_capacity_bytes)
    except Exception:
        vmem_cap = 64 * 1024 * 1024                 # conservative fallback
    vmem_limit = min(vmem_cap // 2, 96 * 1024 * 1024)

    if tile_hw is None:
        # per-HW-lane VMEM cost: double-buffered inputs + 3 f32 accumulators +
        # an allowance for the kernel's live f32 temporaries.
        per_lane = (2 * (B * C * x_b + B * l_b) + 3 * B * 4
                    + 8 * B * C * 4 + 12 * B * 4)
        t = (vmem_limit // 3) // per_lane
    else:
        t = int(tile_hw)
    t = min(max(t, 128), 64 * 1024)
    t = min(t, _round_up(pl.cdiv(HW, P), 128))
    t = max((t // 128) * 128, 128)

    tiles_per_p = pl.cdiv(HW, P * t)
    hw_pad = P * tiles_per_p * t
    if hw_pad != HW:
        x = jnp.pad(x, ((0, 0), (0, 0), (0, hw_pad - HW)))
        lab = jnp.pad(lab, ((0, 0), (0, 0), (0, hw_pad - HW)),
                      constant_values=float(C))     # out-of-range id -> zero weight

    g = gamma
    if float(g).is_integer():
        g = int(g)
    kernel = functools.partial(_wce_focal_kernel, gamma=g, smooth=float(smooth))

    cost = pl.CostEstimate(
        flops=int((8 * C + 30) * B * hw_pad),
        transcendentals=int((C + 3) * B * hw_pad),
        bytes_accessed=int(B * C * hw_pad * x_b + B * hw_pad * l_b
                           + C * 4 + 3 * P * 128 * 4))

    out_sds = jax.ShapeDtypeStruct((P, 1, 128), jnp.float32)
    out_block = pl.BlockSpec((1, 1, 128), lambda p, j: (p, 0, 0))
    ce_num, w_den, foc_sum = pl.pallas_call(
        kernel,
        out_shape=(out_sds, out_sds, out_sds),
        grid_spec=pltpu.PrefetchScalarGridSpec(
            num_scalar_prefetch=0,
            grid=(P, tiles_per_p),
            in_specs=[
                pl.BlockSpec((B, C, t), lambda p, j: (0, 0, p * tiles_per_p + j)),
                pl.BlockSpec((B, 1, t), lambda p, j: (0, 0, p * tiles_per_p + j)),
                pl.BlockSpec((1, C, 1), lambda p, j: (0, 0, 0)),
            ],
            out_specs=(out_block, out_block, out_block),
            scratch_shapes=[
                pltpu.VMEM((B, 1, t), jnp.float32),
                pltpu.VMEM((B, 1, t), jnp.float32),
                pltpu.VMEM((B, 1, t), jnp.float32),
            ]),
        compiler_params=pltpu.CompilerParams(
            dimension_semantics=("parallel", "arbitrary"),
            vmem_limit_bytes=int(vmem_limit)),
        cost_estimate=cost,
    )(x, lab, w_norm)

    loss_ce = jnp.sum(ce_num[:, 0, 0]) / jnp.sum(w_den[:, 0, 0])
    loss_focal = jnp.sum(foc_sum[:, 0, 0]) / float(B * HW)
    return alpha * loss_ce + (1.0 - alpha) * loss_focal


def _compound_wce_focal_ref(logits, labels, weights, alpha, gamma=2, smooth=1e-05):
    """Pure-JAX reference mirroring the torch CompoundWCEFocal forward (f32)."""
    B, C, H, W = logits.shape
    x = logits.astype(jnp.float32)
    logp = jax.nn.log_softmax(x, axis=1)
    p = jnp.exp(logp)
    labels = labels.astype(jnp.int32)
    oh = jax.nn.one_hot(labels, C, axis=1, dtype=jnp.float32)
    # weighted cross entropy (F.cross_entropy, reduction='mean' with weights)
    ce = -jnp.sum(oh * logp, axis=1)                       # (B, H, W)
    w_pix = weights[labels]                                # (B, H, W)
    loss_ce = jnp.sum(w_pix * ce) / jnp.sum(w_pix)
    # focal with clamp-style label smoothing and normalized class weights
    oh_s = jnp.clip(oh, smooth / (C - 1), 1.0 - smooth)
    pt = jnp.sum(oh_s * p, axis=1) + smooth
    a_pix = (weights / jnp.sum(weights))[labels]
    focal = -a_pix * (1.0 - pt) ** gamma * jnp.log(pt)
    loss_focal = jnp.mean(focal)
    return alpha * loss_ce + (1.0 - alpha) * loss_focal


if __name__ == "__main__":
    key = jax.random.PRNGKey(0)
    k1, k2, k3, k4, k5 = jax.random.split(key, 5)

    B, C, H, W = 2, 4, 16, 16
    logits = jax.random.normal(k1, (B, C, H, W), dtype=jnp.float32)
    labels = jax.random.randint(k2, (B, H, W), 0, C, dtype=jnp.int32)
    weights = jax.random.uniform(k3, (C,), dtype=jnp.float32,
                                 minval=0.5, maxval=2.0)
    alpha = 0.3

    # test 1: exact f32 input path vs the f32 reference (tile-aligned HW)
    loss = compound_wce_focal(logits, labels, weights, alpha,
                              cast_logits_to_bf16=False)
    loss = jax.block_until_ready(loss)
    ref = _compound_wce_focal_ref(logits, labels, weights, alpha)
    assert jnp.allclose(loss, ref, rtol=1e-4, atol=1e-5), (loss, ref)

    # test 2: ragged spatial extent (exercises out-of-range label-id padding)
    B2, C2, H2, W2 = 2, 4, 10, 15
    logits2 = jax.random.normal(k4, (B2, C2, H2, W2), dtype=jnp.float32)
    labels2 = jax.random.randint(k5, (B2, H2, W2), 0, C2, dtype=jnp.int32)
    loss2 = compound_wce_focal(logits2, labels2, weights, 0.7,
                               cast_logits_to_bf16=False)
    loss2 = jax.block_until_ready(loss2)
    ref2 = _compound_wce_focal_ref(logits2, labels2, weights, 0.7)
    assert jnp.allclose(loss2, ref2, rtol=1e-4, atol=1e-5), (loss2, ref2)

    # test 3: default bf16-input fast path, compared against the reference run
    # on the same bf16-rounded logits (internal math is f32 in both).
    loss3 = compound_wce_focal(logits, labels, weights, alpha)
    loss3 = jax.block_until_ready(loss3)
    ref3 = _compound_wce_focal_ref(
        logits.astype(jnp.bfloat16).astype(jnp.float32), labels, weights, alpha)
    assert jnp.allclose(loss3, ref3, rtol=2e-4, atol=1e-5), (loss3, ref3)

    print("KERNEL_OK")
</pallas_src>

<mosaic_0001>
module attributes {stable_mosaic.version = 11 : i64} {
  func.func @_wce_focal_kernel(%arg0: i32, %arg1: i32, %arg2: memref<2x4x128xf32, #tpu.memory_space<vmem>>, %arg3: memref<2x1x128xbf16, #tpu.memory_space<vmem>>, %arg4: memref<1x4x1xf32, #tpu.memory_space<vmem>>, %arg5: memref<1x1x128xf32, #tpu.memory_space<vmem>>, %arg6: memref<1x1x128xf32, #tpu.memory_space<vmem>>, %arg7: memref<1x1x128xf32, #tpu.memory_space<vmem>>, %arg8: memref<2x1x128xf32, #tpu.memory_space<vmem>>, %arg9: memref<2x1x128xf32, #tpu.memory_space<vmem>>, %arg10: memref<2x1x128xf32, #tpu.memory_space<vmem>>) attributes {dimension_semantics = [#tpu.dimension_semantics<parallel>, #tpu.dimension_semantics<arbitrary>], iteration_bounds = array<i64: 2, 1>, scalar_prefetch = 0 : i64, scratch_operands = 3 : i64, tpu.core_type = #tpu.core_type<tc>, window_params = [{transform_indices = @transform_0, window_bounds = array<i64: 2, 4, 128>}, {transform_indices = @transform_1, window_bounds = array<i64: 2, 1, 128>}, {pipeline_mode = #tpu.pipeline_mode<synchronous>, transform_indices = @transform_2, window_bounds = array<i64: 1, 4, 1>}, {transform_indices = @transform_3, window_bounds = array<i64: 1, 1, 128>}, {transform_indices = @transform_4, window_bounds = array<i64: 1, 1, 128>}, {transform_indices = @transform_5, window_bounds = array<i64: 1, 1, 128>}]} {
    %c0_i32 = arith.constant 0 : i32
    %0 = arith.cmpi eq, %arg1, %c0_i32 : i32
    %1 = arith.extui %0 : i1 to i32
    %c0_i32_0 = arith.constant 0 : i32
    %2 = arith.cmpi ne, %1, %c0_i32_0 : i32
    scf.if %2 {
      %cst_38 = arith.constant 0.000000e+00 : f32
      %62 = vector.broadcast %cst_38 : f32 to vector<2x1x128xf32>
      %c0_39 = arith.constant 0 : index
      %c0_40 = arith.constant 0 : index
      %c0_41 = arith.constant 0 : index
      %63 = vector.load %arg8[%c0_39, %c0_40, %c0_41] : memref<2x1x128xf32, #tpu.memory_space<vmem>>, vector<2x1x128xf32>
      tpu.vector_store %arg8[%c0_39, %c0_40, %c0_41], %62 {strides = array<i32>} : memref<2x1x128xf32, #tpu.memory_space<vmem>>, vector<2x1x128xf32>,
      %cst_42 = arith.constant 0.000000e+00 : f32
      %64 = vector.broadcast %cst_42 : f32 to vector<2x1x128xf32>
      %c0_43 = arith.constant 0 : index
      %c0_44 = arith.constant 0 : index
      %c0_45 = arith.constant 0 : index
      %65 = vector.load %arg9[%c0_43, %c0_44, %c0_45] : memref<2x1x128xf32, #tpu.memory_space<vmem>>, vector<2x1x128xf32>
      tpu.vector_store %arg9[%c0_43, %c0_44, %c0_45], %64 {strides = array<i32>} : memref<2x1x128xf32, #tpu.memory_space<vmem>>, vector<2x1x128xf32>,
      %cst_46 = arith.constant 0.000000e+00 : f32
      %66 = vector.broadcast %cst_46 : f32 to vector<2x1x128xf32>
      %c0_47 = arith.constant 0 : index
      %c0_48 = arith.constant 0 : index
      %c0_49 = arith.constant 0 : index
      %67 = vector.load %arg10[%c0_47, %c0_48, %c0_49] : memref<2x1x128xf32, #tpu.memory_space<vmem>>, vector<2x1x128xf32>
      tpu.vector_store %arg10[%c0_47, %c0_48, %c0_49], %66 {strides = array<i32>} : memref<2x1x128xf32, #tpu.memory_space<vmem>>, vector<2x1x128xf32>,
    } else {
    }
    %c0 = arith.constant 0 : index
    %c0_1 = arith.constant 0 : index
    %c0_2 = arith.constant 0 : index
    %3 = vector.load %arg2[%c0, %c0_1, %c0_2] : memref<2x4x128xf32, #tpu.memory_space<vmem>>, vector<2x4x128xf32>
    %c0_3 = arith.constant 0 : index
    %c0_4 = arith.constant 0 : index
    %c0_5 = arith.constant 0 : index
    %4 = vector.load %arg3[%c0_3, %c0_4, %c0_5] : memref<2x1x128xbf16, #tpu.memory_space<vmem>>, vector<2x1x128xbf16>
    %5 = arith.extf %4 : vector<2x1x128xbf16> to vector<2x1x128xf32>
    %6 = arith.fptosi %5 : vector<2x1x128xf32> to vector<2x1x128xi32>
    %c0_6 = arith.constant 0 : index
    %c0_7 = arith.constant 0 : index
    %c0_8 = arith.constant 0 : index
    %7 = vector.load %arg4[%c0_6, %c0_7, %c0_8] : memref<1x4x1xf32, #tpu.memory_space<vmem>>, vector<1x4x1xf32>
    %cst = arith.constant dense<0xFF800000> : vector<2x128xf32>
    %8 = vector.multi_reduction <maximumf>, %3, %cst [1] : vector<2x4x128xf32> to vector<2x128xf32>
    %9 = vector.shape_cast %8 : vector<2x128xf32> to vector<2x1x128xf32>
    %10 = vector.broadcast %9 : vector<2x1x128xf32> to vector<2x4x128xf32>
    %11 = arith.subf %3, %10 : vector<2x4x128xf32>
    %12 = math.exp %11 : vector<2x4x128xf32>
    %cst_9 = arith.constant dense<0.000000e+00> : vector<2x128xf32>
    %13 = vector.multi_reduction <add>, %12, %cst_9 [1] : vector<2x4x128xf32> to vector<2x128xf32>
    %14 = vector.shape_cast %13 : vector<2x128xf32> to vector<2x1x128xf32>
    %15 = math.log %14 : vector<2x1x128xf32>
    %16 = arith.addf %15, %9 : vector<2x1x128xf32>
    %17 = tpu.iota {dimensions = array<i32: 1>} : vector<2x4x128xi32>
    %18 = vector.broadcast %6 : vector<2x1x128xi32> to vector<2x4x128xi32>
    %19 = arith.cmpi eq, %17, %18 : vector<2x4x128xi32>
    %20 = arith.extui %19 : vector<2x4x128xi1> to vector<2x4x128xi32>
    %21 = arith.sitofp %20 : vector<2x4x128xi32> to vector<2x4x128xf32>
    %22 = arith.mulf %21, %3 : vector<2x4x128xf32>
    %cst_10 = arith.constant dense<0.000000e+00> : vector<2x128xf32>
    %23 = vector.multi_reduction <add>, %22, %cst_10 [1] : vector<2x4x128xf32> to vector<2x128xf32>
    %24 = vector.shape_cast %23 : vector<2x128xf32> to vector<2x1x128xf32>
    %25 = vector.broadcast %7 : vector<1x4x1xf32> to vector<2x4x128xf32>
    %26 = arith.mulf %21, %25 : vector<2x4x128xf32>
    %cst_11 = arith.constant dense<0.000000e+00> : vector<2x128xf32>
    %27 = vector.multi_reduction <add>, %26, %cst_11 [1] : vector<2x4x128xf32> to vector<2x128xf32>
    %28 = vector.shape_cast %27 : vector<2x128xf32> to vector<2x1x128xf32>
    %29 = arith.subf %16, %24 : vector<2x1x128xf32>
    %30 = arith.subf %24, %16 : vector<2x1x128xf32>
    %31 = math.exp %30 : vector<2x1x128xf32>
    %cst_12 = arith.constant 0.999989986 : f32
    %32 = vector.broadcast %cst_12 : f32 to vector<2x1x128xf32>
    %33 = arith.mulf %32, %31 : vector<2x1x128xf32>
    %cst_13 = arith.constant 1.000000e+00 : f32
    %34 = vector.broadcast %cst_13 : f32 to vector<2x1x128xf32>
    %35 = arith.subf %34, %31 : vector<2x1x128xf32>
    %cst_14 = arith.constant 3.33333332E-6 : f32
    %36 = vector.broadcast %cst_14 : f32 to vector<2x1x128xf32>
    %37 = arith.mulf %36, %35 : vector<2x1x128xf32>
    %38 = arith.addf %33, %37 : vector<2x1x128xf32>
    %cst_15 = arith.constant 9.99999974E-6 : f32
    %39 = vector.broadcast %cst_15 : f32 to vector<2x1x128xf32>
    %40 = arith.addf %38, %39 : vector<2x1x128xf32>
    %41 = math.log %40 : vector<2x1x128xf32>
    %cst_16 = arith.constant 1.000000e+00 : f32
    %42 = vector.broadcast %cst_16 : f32 to vector<2x1x128xf32>
    %43 = arith.subf %42, %40 : vector<2x1x128xf32>
    %44 = arith.mulf %43, %43 : vector<2x1x128xf32>
    %cst_17 = arith.constant 0.000000e+00 : f32
    %45 = vector.broadcast %cst_17 : f32 to vector<2x1x128xf32>
    %46 = arith.subf %45, %28 : vector<2x1x128xf32>
    %47 = arith.mulf %46, %44 : vector<2x1x128xf32>
    %48 = arith.mulf %47, %41 : vector<2x1x128xf32>
    %c0_18 = arith.constant 0 : index
    %c0_19 = arith.constant 0 : index
    %c0_20 = arith.constant 0 : index
    %49 = vector.load %arg8[%c0_18, %c0_19, %c0_20] : memref<2x1x128xf32, #tpu.memory_space<vmem>>, vector<2x1x128xf32>
    %50 = arith.mulf %28, %29 : vector<2x1x128xf32>
    %51 = arith.addf %49, %50 : vector<2x1x128xf32>
    %c0_21 = arith.constant 0 : index
    %c0_22 = arith.constant 0 : index
    %c0_23 = arith.constant 0 : index
    %52 = vector.load %arg8[%c0_21, %c0_22, %c0_23] : memref<2x1x128xf32, #tpu.memory_space<vmem>>, vector<2x1x128xf32>
    tpu.vector_store %arg8[%c0_21, %c0_22, %c0_23], %51 {strides = array<i32>} : memref<2x1x128xf32, #tpu.memory_space<vmem>>, vector<2x1x128xf32>,
    %c0_24 = arith.constant 0 : index
    %c0_25 = arith.constant 0 : index
    %c0_26 = arith.constant 0 : index
    %53 = vector.load %arg9[%c0_24, %c0_25, %c0_26] : memref<2x1x128xf32, #tpu.memory_space<vmem>>, vector<2x1x128xf32>
    %54 = arith.addf %53, %28 : vector<2x1x128xf32>
    %c0_27 = arith.constant 0 : index
    %c0_28 = arith.constant 0 : index
    %c0_29 = arith.constant 0 : index
    %55 = vector.load %arg9[%c0_27, %c0_28, %c0_29] : memref<2x1x128xf32, #tpu.memory_space<vmem>>, vector<2x1x128xf32>
    tpu.vector_store %arg9[%c0_27, %c0_28, %c0_29], %54 {strides = array<i32>} : memref<2x1x128xf32, #tpu.memory_space<vmem>>, vector<2x1x128xf32>,
    %c0_30 = arith.constant 0 : index
    %c0_31 = arith.constant 0 : index
    %c0_32 = arith.constant 0 : index
    %56 = vector.load %arg10[%c0_30, %c0_31, %c0_32] : memref<2x1x128xf32, #tpu.memory_space<vmem>>, vector<2x1x128xf32>
    %57 = arith.addf %56, %48 : vector<2x1x128xf32>
    %c0_33 = arith.constant 0 : index
    %c0_34 = arith.constant 0 : index
    %c0_35 = arith.constant 0 : index
    %58 = vector.load %arg10[%c0_33, %c0_34, %c0_35] : memref<2x1x128xf32, #tpu.memory_space<vmem>>, vector<2x1x128xf32>
    tpu.vector_store %arg10[%c0_33, %c0_34, %c0_35], %57 {strides = array<i32>} : memref<2x1x128xf32, #tpu.memory_space<vmem>>, vector<2x1x128xf32>,
    %c0_i32_36 = arith.constant 0 : i32
    %59 = arith.cmpi eq, %arg1, %c0_i32_36 : i32
    %60 = arith.extui %59 : i1 to i32
    %c0_i32_37 = arith.constant 0 : i32
    %61 = arith.cmpi ne, %60, %c0_i32_37 : i32
    scf.if %61 {
      %c0_38 = arith.constant 0 : index
      %c0_39 = arith.constant 0 : index
      %c0_40 = arith.constant 0 : index
      %62 = vector.load %arg8[%c0_38, %c0_39, %c0_40] : memref<2x1x128xf32, #tpu.memory_space<vmem>>, vector<2x1x128xf32>
      %63 = vector.shape_cast %62 : vector<2x1x128xf32> to vector<1x2x1x128xf32>
      %cst_41 = arith.constant dense<0.000000e+00> : vector<1xf32>
      %64 = vector.multi_reduction <add>, %63, %cst_41 [1, 2, 3] : vector<1x2x1x128xf32> to vector<1xf32>
      %65 = vector.shape_cast %64 : vector<1xf32> to vector<1x1x1x1xf32>
      %66 = vector.extract %65[0, 0, 0, 0] : f32 from vector<1x1x1x1xf32>
      %67 = vector.broadcast %66 : f32 to vector<1x1x128xf32>
      %c0_42 = arith.constant 0 : index
      %c0_43 = arith.constant 0 : index
      %c0_44 = arith.constant 0 : index
      %68 = vector.load %arg5[%c0_42, %c0_43, %c0_44] : memref<1x1x128xf32, #tpu.memory_space<vmem>>, vector<1x1x128xf32>
      tpu.vector_store %arg5[%c0_42, %c0_43, %c0_44], %67 {strides = array<i32>} : memref<1x1x128xf32, #tpu.memory_space<vmem>>, vector<1x1x128xf32>,
      %c0_45 = arith.constant 0 : index
      %c0_46 = arith.constant 0 : index
      %c0_47 = arith.constant 0 : index
      %69 = vector.load %arg9[%c0_45, %c0_46, %c0_47] : memref<2x1x128xf32, #tpu.memory_space<vmem>>, vector<2x1x128xf32>
      %70 = vector.shape_cast %69 : vector<2x1x128xf32> to vector<1x2x1x128xf32>
      %cst_48 = arith.constant dense<0.000000e+00> : vector<1xf32>
      %71 = vector.multi_reduction <add>, %70, %cst_48 [1, 2, 3] : vector<1x2x1x128xf32> to vector<1xf32>
      %72 = vector.shape_cast %71 : vector<1xf32> to vector<1x1x1x1xf32>
      %73 = vector.extract %72[0, 0, 0, 0] : f32 from vector<1x1x1x1xf32>
      %74 = vector.broadcast %73 : f32 to vector<1x1x128xf32>
      %c0_49 = arith.constant 0 : index
      %c0_50 = arith.constant 0 : index
      %c0_51 = arith.constant 0 : index
      %75 = vector.load %arg6[%c0_49, %c0_50, %c0_51] : memref<1x1x128xf32, #tpu.memory_space<vmem>>, vector<1x1x128xf32>
      tpu.vector_store %arg6[%c0_49, %c0_50, %c0_51], %74 {strides = array<i32>} : memref<1x1x128xf32, #tpu.memory_space<vmem>>, vector<1x1x128xf32>,
      %c0_52 = arith.constant 0 : index
      %c0_53 = arith.constant 0 : index
      %c0_54 = arith.constant 0 : index
      %76 = vector.load %arg10[%c0_52, %c0_53, %c0_54] : memref<2x1x128xf32, #tpu.memory_space<vmem>>, vector<2x1x128xf32>
      %77 = vector.shape_cast %76 : vector<2x1x128xf32> to vector<1x2x1x128xf32>
      %cst_55 = arith.constant dense<0.000000e+00> : vector<1xf32>
      %78 = vector.multi_reduction <add>, %77, %cst_55 [1, 2, 3] : vector<1x2x1x128xf32> to vector<1xf32>
      %79 = vector.shape_cast %78 : vector<1xf32> to vector<1x1x1x1xf32>
      %80 = vector.extract %79[0, 0, 0, 0] : f32 from vector<1x1x1x1xf32>
      %81 = vector.broadcast %80 : f32 to vector<1x1x128xf32>
      %c0_56 = arith.constant 0 : index
      %c0_57 = arith.constant 0 : index
      %c0_58 = arith.constant 0 : index
      %82 = vector.load %arg7[%c0_56, %c0_57, %c0_58] : memref<1x1x128xf32, #tpu.memory_space<vmem>>, vector<1x1x128xf32>
      tpu.vector_store %arg7[%c0_56, %c0_57, %c0_58], %81 {strides = array<i32>} : memref<1x1x128xf32, #tpu.memory_space<vmem>>, vector<1x1x128xf32>,
    } else {
    }
    return
  }
  func.func @transform_0(%arg0: i32, %arg1: i32) -> (i32, i32, i32) {
    %c1_i32 = arith.constant 1 : i32
    %0 = arith.muli %arg0, %c1_i32 : i32
    %1 = arith.addi %0, %arg1 : i32
    %c0_i32 = arith.constant 0 : i32
    %c0_i32_0 = arith.constant 0 : i32
    %c0_i32_1 = arith.constant 0 : i32
    return %c0_i32, %c0_i32_0, %1 : i32, i32, i32
  }
  func.func @transform_1(%arg0: i32, %arg1: i32) -> (i32, i32, i32) {
    %c1_i32 = arith.constant 1 : i32
    %0 = arith.muli %arg0, %c1_i32 : i32
    %1 = arith.addi %0, %arg1 : i32
    %c0_i32 = arith.constant 0 : i32
    %c0_i32_0 = arith.constant 0 : i32
    %c0_i32_1 = arith.constant 0 : i32
    return %c0_i32, %c0_i32_0, %1 : i32, i32, i32
  }
  func.func @transform_2(%arg0: i32, %arg1: i32) -> (i32, i32, i32) {
    %c0_i32 = arith.constant 0 : i32
    %c0_i32_0 = arith.constant 0 : i32
    %c0_i32_1 = arith.constant 0 : i32
    %c0_i32_2 = arith.constant 0 : i32
    return %c0_i32, %c0_i32_0, %c0_i32_1 : i32, i32, i32
  }
  func.func @transform_3(%arg0: i32, %arg1: i32) -> (i32, i32, i32) {
    %c0_i32 = arith.constant 0 : i32
    %c0_i32_0 = arith.constant 0 : i32
    %c0_i32_1 = arith.constant 0 : i32
    return %arg0, %c0_i32, %c0_i32_0 : i32, i32, i32
  }
  func.func @transform_4(%arg0: i32, %arg1: i32) -> (i32, i32, i32) {
    %c0_i32 = arith.constant 0 : i32
    %c0_i32_0 = arith.constant 0 : i32
    %c0_i32_1 = arith.constant 0 : i32
    return %arg0, %c0_i32, %c0_i32_0 : i32, i32, i32
  }
  func.func @transform_5(%arg0: i32, %arg1: i32) -> (i32, i32, i32) {
    %c0_i32 = arith.constant 0 : i32
    %c0_i32_0 = arith.constant 0 : i32
    %c0_i32_1 = arith.constant 0 : i32
    return %arg0, %c0_i32, %c0_i32_0 : i32, i32, i32
  }
}

</mosaic_0001>

<bundles_post_ra>
// kernel: tpu_custom_call.1
= control target key start
LH: loop header
LB: loop body
LE: loop exit
PB: predicated region body
PF: predicated region fallthrough
CT: control target
= control target key end

     0   :  { %s1322_s0 = inlined_call_operand.hbm [shape: f32[2,4,256], index: 0, kind: input, shape index: {}]   ;;  %s1323_s1 = inlined_call_operand.vmem [shape: bf16[2,1,256], index: 1, kind: input, shape index: {}]   ;;  %s1324_s2 = inlined_call_operand.vmem [shape: f32[1,4,1], index: 2, kind: input, shape index: {}]   ;;  %s1325_s3 = inlined_call_operand.hbm [shape: f32[2,1,128], index: 3, kind: output, shape index: {0}]   ;;  %s1326_s4 = inlined_call_operand.hbm [shape: f32[2,1,128], index: 4, kind: output, shape index: {1}]   ;;  %s1327_s5 = inlined_call_operand.hbm [shape: f32[2,1,128], index: 5, kind: output, shape index: {2}]  }
   0x1   :  { %1331 = sst [smem:[#allocation17_spill]] %s1322_s0 }
   0x2   :  { %11 = vsyncpa [#allocation6], 0 }
   0x3   :  { %13 = vsyncpa [#allocation6 + $0x1], 0 }
   0x4   :  { %14 = vsyncpa [#allocation7], 0 }
   0x5   :  { %16 = vsyncpa [#allocation7 + $0x1], 0 }
   0x6   :  { %17 = vsyncpa [#allocation11], 0 }
   0x7   :  { %19 = vsyncpa [#allocation11 + $0x1], 0  ;;  %s1064_s18 = smov 0   ;;  %s1066_s19 = smov 0  }
   0x8   :  { %s1068_s20 = smov 0   ;;  %s1070_s21 = smov 0  }
   0x9   :  { %s1072_s22 = smov 0   ;;  %s1074_s23 = smov 0  }
   0xa LB: > { %s1095_s24 = sadd.s32 4294967295, %s1023_s23   ;;  %s1328_s25 = sadd.s32 4294967294, %s1023_s23   ;;  %s1023_s23 = sphi %s1074_s23, %s25_s23   ;;  %s1019_s22 = sphi %s1072_s22, %s1346_s22   ;;  %s1015_s21 = sphi %s1070_s21, %s1345_s21   ;;  %s1011_s20 = sphi %s1068_s20, %s1344_s20   ;;  %s1007_s19 = sphi %s1066_s19, %s1343_s19   ;;  %s1003_s18 = sphi %s1064_s18, %s1342_s18  }
   0xb   : > { %s37_s26 = sadd.s32 1, %s1019_s22  ;;  %s46_s27 = sadd.s32 1, %s1011_s20 }
   0xc   : > { %p39_p0 = scmp.ge.s32.totalorder %s37_s26, 2  ;;  %p53_p1 = scmp.ne.s32.totalorder %s1011_s20, %s1007_s19 }
   0xd   : > { %p54_p2 = scmp.eq.s32.totalorder %s1023_s23, 0  ;;  %p59_p3 = scmp.ne.s32.totalorder %s1007_s19, %s1003_s18 }
   0xe   : > { %s1348_s26 = smov (%p39_p0, %s37_s26), 0  ;;  %p60_p5 = scmp.eq.s32.totalorder %s1095_s24, 0 }
   0xf   : > { %1332 = sst [smem:[#allocation16_spill]] %s1348_s26  ;;  %p1107_p4 = por %p54_p2, %p53_p1 }
  0x10   : > { %s43_s29 = ssub.s32 %s1019_s22, %s1348_s26  ;;  %p132_p6 = scmp.eq.s32.totalorder %s1095_s24, 1 }
  0x11   : > { %p44_p7 = scmp.eq.s32.totalorder %s43_s29, 0  ;;  %p1115_p8 = por %p60_p5, %p59_p3 }
  0x12   : > { %p1119_p9 = por %p132_p6, %p53_p1  ;;  %p138_p10 = scmp.eq.s32.totalorder %s1328_s25, 1 }
  0x13   : > { %s1126_s7 = scalar_select %p44_p7, %s1011_s20, %s46_s27  }
  0x14   : > { %p1128_p11 = por %p138_p10, %p59_p3  ;;  %p748_p12 = scmp.ge.s32.totalorder %s1023_s23, 2 }
  0x15   : > { %s1136_s9 = sand.u32 (!%p748_p12), 1, %s1011_s20   ;;  %s750_s10 = sshll.u32 (!%p748_p12), %s1019_s22, 6 }
  0x16   : > { %209 = sbr.rel (%p748_p12) target bundleno = 41 (0x29), region = 20  ;;  %s749_s11 = sshll.u32 (!%p748_p12), %s1136_s9, 3 }
  0x17   : > { %s1337_s0 = sld [smem:[#allocation17_spill]] (!%p748_p12)  ;;  %s217_s15 = scalar_lea.vmem (!%p748_p12), [#allocation5], %s749_s11 }
  0x18   : > { %s224_s16 = sshll.u32 (!%p748_p12), %s217_s15, 4  ;;  %s214_s17 = scalar_lea.sflag (!%p748_p12), [#allocation6], %s1136_s9  ;;  %s225_s16 = int_to_ptr.vmem [resolvable:$true] %s224_s16 }
  0x19   : > { %s873_s27 = scalar_lea.vmem (!%p748_p12), %s225_s16, 128  ;;  %s1025_s29 = smov (!%p748_p12), [#allocation5]  }
  0x1a   : > { %p874_p13 = scmp.ne.s32.totalorder (!%p748_p12), %s225_s16, %s873_s27  ;;  %s877_s25 = sshll.u32 (!%p748_p12), %s1025_s29, 4  ;;  %s878_s25 = int_to_ptr.vmem [resolvable:$false] %s877_s25 }
  0x1b   : > { %s879_s26 = scalar_lea.vmem %s878_s25, 256  ;;  %p880_p2 = scmp.lt.s32.totalorder %s225_s16, %s878_s25 }
  0x1c   : > { %p875_p0 = pnand %p874_p13, %p1107_p4  ;;  %p881_p3 = scmp.lt.s32.totalorder %s879_s26, %s873_s27 }
  0x1d   : > { %s223_s14 = scalar_lea.hbm %s1337_s0, %s750_s10 }
  0x1e   : > { %p876_p1 = pneg %p875_p0  ;;  %p882_p5 = por %p881_p3, %p880_p2 }
  0x20   : > { %p883_p6 = pnand %p882_p5, %p876_p1 }
  0x22   : > { %886 = shalt.err (!%p883_p6)
}
  0x23   : > { %s1026_s12 = smov 128   ;;  %s1027_s10 = smov 64  }
  0x24   : > { %s1028_s11 = smov 4   ;;  %233 = sbr.rel (!%p1107_p4) target bundleno = 41 (0x29), region = 28 }
  0x25   : > { %772 = dma.hbm_to_vmem [thread:$0]  (%p1107_p4), %s223_s14, 128, %s225_s16, %s214_s17, %s1026_s12, %s1027_s10, %s1028_s11  }
  0x26   : > { %s751_s13 = sshll.u32 (%p1107_p4), %s1136_s9, 1  ;;  %s239_s25 = scalar_lea.vmem (%p1107_p4), %s1323_s1, %s1019_s22 }
  0x27   : > { %v256_v0 = vld [vmem:[%s239_s25] sm:$0x1] (%p1107_p4)  ;;  %v258_v1 = vld [vmem:[%s239_s25 + $0x2] sm:$0x1] (%p1107_p4)  ;;  %s237_s26 = scalar_lea.vmem (%p1107_p4), [#allocation8], %s751_s13 }
  0x28   : > { %257 = vst [vmem:[%s237_s26] sm:$0x1] (%p1107_p4), %v256_v0  ;;  %259 = vst [vmem:[%s237_s26 + $0x1] sm:$0x1] (%p1107_p4), %v258_v1 }
  0x29 PF: > { %p752_p7 = scmp.ge.s32.totalorder %s1023_s23, 1  ;;  %p278_p10 = scmp.lt.s32.totalorder %s1023_s23, 3 }
  0x2b   : > { %p279_p13 = pnand %p752_p7, %p278_p10 }
  0x2c   : > { %s1158_s28 = sand.u32 (!%p279_p13), 1, %s1007_s19  }
  0x2d   : > { %282 = sbr.rel (%p279_p13) target bundleno = 474 (0x1da), region = 62  ;;  %s753_s9 = sshll.u32 (!%p279_p13), %s1158_s28, 3 }
  0x2e   : > { %s285_s14 = scalar_lea.sflag (!%p279_p13), [#allocation6], %s1158_s28  ;;  %s288_s16 = scalar_lea.vmem (!%p279_p13), [#allocation5], %s753_s9 }
  0x32   : > { %990 = dma.done.wait (%p1115_p8), %s285_s14, 128  }
  0x33   : > { %992 = vsyncadd (%p1115_p8), %s285_s14, 4294967168  ;;  %v1029_v2 = vmov 0   ;;  %v1030_v3 = vmov 0.0   ;;  %vm354_vm0 = vcmask 1043456   ;;  %v353_v4 = vld [vmem:[%s1324_s2] sm:$0xf]  ;;  %v395_v27 = vlaneseq }
  0x34   : > { %844 = vset.pattern.permute.xlu0 %v1029_v2  ;;  %339 = vst [vmem:[#allocation2] sm:$0x1] %v1030_v3  ;;  %340 = vst [vmem:[#allocation2 + $0x1] sm:$0x1] %v1030_v3  ;;  %v345_v5 = vld [vmem:[%s288_s16] sm:$0xf] }
  0x35   : > { %341 = vst [vmem:[#allocation3] sm:$0x1] %v1030_v3  ;;  %342 = vst [vmem:[#allocation3 + $0x1] sm:$0x1] %v1030_v3  ;;  %v346_v6 = vld [vmem:[%s288_s16 + $0x4] sm:$0xf]  ;;  %429 = vperm.xlu0 %844, %v353_v4  }
  0x36   : > { %343 = vst [vmem:[#allocation4] sm:$0x1] %v1030_v3  ;;  %344 = vst [vmem:[#allocation4 + $0x1] sm:$0x1] %v1030_v3  ;;  %v355_v7 = vsel %vm354_vm0, %v345_v5, -inf  ;;  %v362_v8 = vsel %vm354_vm0, %v346_v6, -inf }
  0x37   : > { %v356_v9 = vrot.slane %v355_v7, 4  ;;  %v363_v10 = vrot.slane %v362_v8, 4  ;;  %s754_s30 = sshll.u32 %s1158_s28, 1  ;;  %v396_v33 = vshrl.u32 %v395_v27, 7  ;;  %vm505_vm3 = vcmask 1040384   ;;  %s1194_s11 = sshll.u32 %s1015_s21, 4 }
  0x38   : > { %s296_s12 = scalar_lea.vmem [#allocation8], %s754_s30  ;;  %s1330_s13 = scalar_lea.vmem [#allocation12], %s1158_s28 }
  0x39   : > { %v357_v11 = vmax.f32 %v355_v7, %v356_v9  ;;  %v364_v12 = vmax.f32 %v362_v8, %v363_v10  ;;  %v347_v25 = vld [vmem:[%s296_s12] sm:$0x1]  ;;  %v348_v26 = vld [vmem:[%s296_s12 + $0x1] sm:$0x1]  ;;  %v399_v39 = vsub.s32 0, %v396_v33  ;;  %s599_s15 = sshll.u32 %s1330_s13, 4  ;;  %s1205_s17 = scalar_lea.hbm %s1325_s3, %s1194_s11  ;;  %s1209_s15 = int_to_ptr.vmem [resolvable:$true] %s599_s15 }
  0x3a   : > { %v349_v28 = vunpack.c.l.bf16 %v347_v25  ;;  %v350_v29 = vunpack.c.l.bf16 %v348_v26  ;;  %s320_s29 = scalar_lea.vmem [#allocation9], %s1158_s28  ;;  %s326_s26 = scalar_lea.vmem [#allocation10], %s1158_s28 }
  0x3b   : > { %v358_v13 = vrot.slane %v357_v11, 2  ;;  %v365_v14 = vrot.slane %v364_v12, 2  ;;  %s573_s25 = sshll.u32 %s320_s29, 4  ;;  %s586_s9 = sshll.u32 %s326_s26, 4  ;;  %s1207_s25 = int_to_ptr.vmem [resolvable:$true] %s573_s25  ;;  %s1217_s9 = int_to_ptr.vmem [resolvable:$true] %s586_s9 }
  0x3c   : > { %v762_v34 = vtrunc.f32 %v349_v28  ;;  %v764_v36 = vtrunc.f32 %v350_v29  ;;  %s1215_s13 = scalar_lea.hbm %s1326_s4, %s1194_s11  ;;  %s553_s14 = scalar_lea.sflag [#allocation7], %s1158_s28 }
  0x3d   : > { %v359_v15 = vmax.f32 %v357_v11, %v358_v13  ;;  %v366_v16 = vmax.f32 %v364_v12, %v365_v14  ;;  %s887_s16 = scalar_lea.vmem %s1207_s25, 16 }
  0x3e   : > { %v763_v40 = vcvt.f32.s32 %v762_v34  ;;  %v765_v41 = vcvt.f32.s32 %v764_v36  ;;  %p888_p4 = scmp.ne.s32.totalorder %s1207_s25, %s887_s16 }
  0x3f   : > { %v360_v17 = vrot.slane %v359_v15, 1  ;;  %v367_v18 = vrot.slane %v366_v16, 1 }
  0x40   : > { %v400_v44 = vrot.slane %v763_v40, %v399_v39  ;;  %v404_v46 = vrot.slane %v765_v41, %v399_v39  ;;  %p889_p8 = pnand %p888_p4, %p1119_p9 }
  0x41   : > { %v1171_v19 = vmax.f32 %v359_v15, %v360_v17  ;;  %v1173_v20 = vmax.f32 %v366_v16, %v367_v18 }
  0x42   : > { %vm405_vm1 = vcmp.eq.s32.totalorder %v396_v33, %v400_v44  ;;  %vm406_vm2 = vcmp.eq.s32.totalorder %v396_v33, %v404_v46  ;;  %p890_p0 = pneg %p889_p8 }
  0x43   : > { %v369_v21 = vsub.f32 %v345_v5, %v1171_v19  ;;  %v370_v22 = vsub.f32 %v346_v6, %v1173_v20  ;;  %v755_v50 = vsel %vm405_vm1, 1.0, %v1030_v3  ;;  %v756_v51 = vsel %vm406_vm2, 1.0, %v1030_v3 }
  0x44   : > { %v411_v54 = vmul.f32 %v755_v50, %v345_v5  ;;  %v412_v55 = vmul.f32 %v756_v51, %v346_v6 }
  0x45   : > { %v371_v23 = vmul.f32 1.442695, %v369_v21  ;;  %v373_v24 = vmul.f32 1.442695, %v370_v22 }
  0x46   : > { %v413_v58 = vsel %vm354_vm0, %v411_v54, 0.0  ;;  %v420_v59 = vsel %vm354_vm0, %v412_v55, 0.0  ;;  %v480_v55 = vld [vmem:[#allocation2] sm:$0x1] }
  0x47   : > { %845 = vpow2.f32 %v371_v23  ;;  %v414_v60 = vrot.slane %v413_v58, 4  ;;  %v421_v61 = vrot.slane %v420_v59, 4 }
  0x48   : > { %847 = vpow2.f32 %v373_v24 }
  0x49   : > { %v415_v62 = vadd.f32 %v414_v60, %v413_v58  ;;  %v422_v63 = vadd.f32 %v421_v61, %v420_v59  ;;  %v481_v60 = vld [vmem:[#allocation2 + $0x1] sm:$0x1] }
  0x4b   : > { %v416_v0 = vrot.slane %v415_v62, 2  ;;  %v423_v1 = vrot.slane %v422_v63, 2 }
  0x4d   : > { %v417_v2 = vadd.f32 %v416_v0, %v415_v62  ;;  %v424_v4 = vadd.f32 %v423_v1, %v422_v63 }
  0x4f   : > { %v418_v6 = vrot.slane %v417_v2, 1  ;;  %v425_v9 = vrot.slane %v424_v4, 1 }
  0x51   : > { %v419_v11 = vadd.f32 %v418_v6, %v417_v2  ;;  %v426_v13 = vadd.f32 %v425_v9, %v424_v4  ;;  %v494_v6 = vld [vmem:[#allocation4] sm:$0x1] }
  0x54   : > { %v846_v30 = vpop.eup %845 }
  0x55   : > { %v848_v31 = vpop.eup %847  ;;  %v375_v32 = vsel %vm354_vm0, %v846_v30, 0.0 }
  0x56   : > { %v382_v35 = vsel %vm354_vm0, %v848_v31, 0.0  ;;  %v376_v37 = vrot.slane %v375_v32, 4 }
  0x57   : > { %v383_v38 = vrot.slane %v382_v35, 4 }
  0x58   : > { %v377_v42 = vadd.f32 %v376_v37, %v375_v32 }
  0x59   : > { %v384_v43 = vadd.f32 %v383_v38, %v382_v35 }
  0x5a   : > { %v378_v45 = vrot.slane %v377_v42, 2 }
  0x5b   : > { %v385_v47 = vrot.slane %v384_v43, 2 }
  0x5c   : > { %v379_v48 = vadd.f32 %v378_v45, %v377_v42 }
  0x5d   : > { %v386_v49 = vadd.f32 %v385_v47, %v384_v43 }
  0x5e   : > { %v380_v52 = vrot.slane %v379_v48, 1 }
  0x5f   : > { %v387_v53 = vrot.slane %v386_v49, 1 }
  0x60   : > { %v381_v56 = vadd.f32 %v380_v52, %v379_v48 }
  0x61   : > { %v388_v57 = vadd.f32 %v387_v53, %v386_v49 }
  0x62   : > { %849 = vlog2.f32 %v381_v56  ;;  %v488_v56 = vld [vmem:[#allocation3] sm:$0x1] }
  0x63   : > { %851 = vlog2.f32 %v388_v57  ;;  %v489_v57 = vld [vmem:[#allocation3 + $0x1] sm:$0x1] }
  0x6f   : > { %v850_v3 = vpop.eup %849 }
  0x70   : > { %v852_v7 = vpop.eup %851  ;;  %v390_v5 = vmul.f32 0.6931472, %v850_v3 }
  0x71   : > { %v392_v8 = vmul.f32 0.6931472, %v852_v7 }
  0x72   : > { %v393_v10 = vadd.f32 %v390_v5, %v1171_v19 }
  0x73   : > { %v394_v12 = vadd.f32 %v392_v8, %v1173_v20  ;;  %v495_v8 = vld [vmem:[#allocation4 + $0x1] sm:$0x1] }
  0x74   : > { %v450_v14 = vsub.f32 %v419_v11, %v393_v10  ;;  %v448_v49 = vsub.f32 %v393_v10, %v419_v11 }
  0x75   : > { %v451_v15 = vsub.f32 %v426_v13, %v394_v12 }
  0x76   : > { %v452_v16 = vmul.f32 1.442695, %v450_v14 }
  0x77   : > { %v454_v17 = vmul.f32 1.442695, %v451_v15 }
  0x78   : > { %853 = vpow2.f32 %v452_v16 }
  0x79   : > { %855 = vpow2.f32 %v454_v17 }
  0x85   : > { %v854_v18 = vpop.eup %853 }
  0x86   : > { %v856_v21 = vpop.eup %855  ;;  %v458_v22 = vsub.f32 1.0, %v854_v18  ;;  %v456_v24 = vmul.f32 0.99999, %v854_v18 }
  0x87   : > { %v459_v23 = vsub.f32 1.0, %v856_v21  ;;  %v457_v26 = vmul.f32 0.99999, %v856_v21 }
  0x88   : > { %v460_v25 = vmul.f32 3.3333333e-06, %v458_v22 }
  0x89   : > { %v461_v27 = vmul.f32 3.3333333e-06, %v459_v23 }
  0x8a   : > { %v462_v28 = vadd.f32 %v460_v25, %v456_v24 }
  0x8b   : > { %v463_v19 = vadd.f32 %v461_v27, %v457_v26 }
  0x8c   : > { %v464_v29 = vadd.f32 1e-05, %v462_v28 }
  0x8d   : > { %v465_v30 = vadd.f32 1e-05, %v463_v19 }
  0x8e   : > { %857 = vlog2.f32 %v464_v29  ;;  %v470_v43 = vsub.f32 1.0, %v464_v29 }
  0x8f   : > { %859 = vlog2.f32 %v465_v30  ;;  %v471_v44 = vsub.f32 1.0, %v465_v30 }
  0x90   : > { %v472_v53 = vmul.f32 %v470_v43, %v470_v43 }
  0x91   : > { %v473_v54 = vmul.f32 %v471_v44, %v471_v44 }
  0x9b   : > { %v858_v45 = vpop.eup %857 }
  0x9c   : > { %v860_v46 = vpop.eup %859  ;;  %v467_v58 = vmul.f32 0.6931472, %v858_v45 }
  0x9d   : > { %v469_v59 = vmul.f32 0.6931472, %v860_v46 }
  0xb0   : > { %v430_v20 = vpop.permute.xlu0 %429 }
  0xb1   : > { %v432_v31 = vmul.f32 %v755_v50, %v430_v20  ;;  %v433_v32 = vmul.f32 %v756_v51, %v430_v20  ;;  %v449_v50 = vsub.f32 %v394_v12, %v426_v13 }
  0xb3   : > { %v434_v33 = vsel %vm354_vm0, %v432_v31, 0.0  ;;  %v441_v34 = vsel %vm354_vm0, %v433_v32, 0.0 }
  0xb4   : > { %v435_v35 = vrot.slane %v434_v33, 4  ;;  %v442_v36 = vrot.slane %v441_v34, 4 }
  0xb6   : > { %v436_v37 = vadd.f32 %v435_v35, %v434_v33  ;;  %v443_v38 = vadd.f32 %v442_v36, %v441_v34 }
  0xb8   : > { %v437_v39 = vrot.slane %v436_v37, 2  ;;  %v444_v40 = vrot.slane %v443_v38, 2 }
  0xba   : > { %v438_v41 = vadd.f32 %v437_v39, %v436_v37  ;;  %v445_v42 = vadd.f32 %v444_v40, %v443_v38 }
  0xbc   : > { %v439_v47 = vrot.slane %v438_v41, 1  ;;  %v446_v48 = vrot.slane %v445_v42, 1 }
  0xbe   : > { %v440_v51 = vadd.f32 %v439_v47, %v438_v41  ;;  %v447_v52 = vadd.f32 %v446_v48, %v445_v42 }
  0xc0   : > { %v474_v61 = vsub.f32 0.0, %v440_v51  ;;  %v475_v62 = vsub.f32 0.0, %v447_v52  ;;  %v482_v63 = vmul.f32 %v448_v49, %v440_v51  ;;  %v483_v0 = vmul.f32 %v449_v50, %v447_v52 }
  0xc1   : > { %v490_v1 = vadd.f32 %v488_v56, %v440_v51  ;;  %v491_v2 = vadd.f32 %v489_v57, %v447_v52 }
  0xc2   : > { %v476_v3 = vmul.f32 %v474_v61, %v472_v53  ;;  %v477_v4 = vmul.f32 %v475_v62, %v473_v54  ;;  %v484_v7 = vadd.f32 %v482_v63, %v480_v55  ;;  %v485_v5 = vadd.f32 %v483_v0, %v481_v60 }
  0xc3   : > { %492 = vst [vmem:[#allocation3] sm:$0x1] %v490_v1  ;;  %493 = vst [vmem:[#allocation3 + $0x1] sm:$0x1] %v491_v2 }
  0xc4   : > { %v478_v9 = vmul.f32 %v476_v3, %v467_v58  ;;  %v479_v10 = vmul.f32 %v477_v4, %v469_v59  ;;  %486 = vst [vmem:[#allocation2] sm:$0x1] %v484_v7  ;;  %487 = vst [vmem:[#allocation2 + $0x1] sm:$0x1] %v485_v5 }
  0xc6   : > { %v496_v11 = vadd.f32 %v494_v6, %v478_v9  ;;  %v497_v12 = vadd.f32 %v495_v8, %v479_v10 }
  0xc8   : > { %498 = vst [vmem:[#allocation4] sm:$0x1] %v496_v11  ;;  %499 = vst [vmem:[#allocation4 + $0x1] sm:$0x1] %v497_v12 }
  0xca   : > { %v520_v13 = vld [vmem:[#allocation3] sm:$0x1]  ;;  %v521_v14 = vld [vmem:[#allocation3 + $0x1] sm:$0x1] }
  0xcb   : > { %v522_v15 = vsel %vm505_vm3, %v520_v13, 0.0  ;;  %v523_v16 = vsel %vm505_vm3, %v521_v14, 0.0  ;;  %v503_v17 = vld [vmem:[#allocation2] sm:$0x1]  ;;  %v504_v18 = vld [vmem:[#allocation2 + $0x1] sm:$0x1] }
  0xcc   : > { %v524_v21 = vadd.f32 %v523_v16, %v522_v15  ;;  %v506_v22 = vsel %vm505_vm3, %v503_v17, 0.0  ;;  %v507_v23 = vsel %vm505_vm3, %v504_v18, 0.0 }
  0xcd   : > { %v508_v24 = vadd.f32 %v507_v23, %v506_v22 }
  0xce   : > { %525 = vadd.xlane.f32.xlu1 %v524_v21 }
  0xcf   : > { %509 = vadd.xlane.f32.xlu0 %v508_v24  ;;  %v536_v25 = vld [vmem:[#allocation4] sm:$0x1]  ;;  %v537_v26 = vld [vmem:[#allocation4 + $0x1] sm:$0x1] }
  0xd0   : > { %v538_v27 = vsel %vm505_vm3, %v536_v25, 0.0  ;;  %v539_v28 = vsel %vm505_vm3, %v537_v26, 0.0 }
  0xd1   : > { %v540_v19 = vadd.f32 %v539_v28, %v538_v27 }
  0xd3   : > { %541 = vadd.xlane.f32.xlu1 %v540_v19 }
 0x157   : > { %v526_v29 = vpop.xlane.xlu1 %525 }
 0x158   : > { %v527_v30 = vrot.slane %v526_v29, 4  ;;  %v510_v20 = vpop.xlane.xlu0 %509 }
 0x159   : > { %v511_v31 = vrot.slane %v510_v20, 4 }
 0x15a   : > { %v528_v32 = vadd.f32 %v527_v30, %v526_v29 }
 0x15b   : > { %v512_v33 = vadd.f32 %v511_v31, %v510_v20 }
 0x15c   : > { %v529_v34 = vrot.slane %v528_v32, 2  ;;  %v542_v35 = vpop.xlane.xlu1 %541 }
 0x15d   : > { %v513_v36 = vrot.slane %v512_v33, 2  ;;  %v543_v37 = vrot.slane %v542_v35, 4 }
 0x15e   : > { %v530_v38 = vadd.f32 %v529_v34, %v528_v32 }
 0x15f   : > { %v544_v39 = vadd.f32 %v543_v37, %v542_v35  ;;  %v514_v40 = vadd.f32 %v513_v36, %v512_v33 }
 0x160   : > { %v531_v41 = vrot.slane %v530_v38, 1 }
 0x161   : > { %v545_v42 = vrot.slane %v544_v39, 2  ;;  %v515_v43 = vrot.slane %v514_v40, 1 }
 0x162   : > { %v532_v46 = vadd.f32 %v531_v41, %v530_v38 }
 0x163   : > { %v546_v44 = vadd.f32 %v545_v42, %v544_v39  ;;  %v516_v45 = vadd.f32 %v515_v43, %v514_v40 }
 0x165   : > { %766 = vpush %v516_v45  ;;  %v547_v47 = vrot.slane %v546_v44, 1 }
 0x166   : > { %768 = vpush %v532_v46 }
 0x167   : > { %v548_v48 = vadd.f32 %v547_v47, %v546_v44 }
 0x169   : > { %770 = vpush %v548_v48 }
 0x196   : > { %s767_s27 = spop %766 }
 0x197   : > { %v518_v49 = vstv %s767_s27  ;;  %s769_s21 = spop %768  ;;  %s1031_s27 = smov [#allocation9]  }
 0x198   : > { %519 = vst [vmem:[%s320_s29] sm:$0x1] %v518_v49  ;;  %v534_v50 = vstv %s769_s21  ;;  %s891_s10 = sshll.u32 %s1031_s27, 4  ;;  %s892_s10 = int_to_ptr.vmem [resolvable:$false] %s891_s10 }
 0x199   : > { %535 = vst [vmem:[%s326_s26] sm:$0x1] %v534_v50  ;;  %s893_s0 = scalar_lea.vmem %s892_s10, 32  ;;  %p894_p1 = scmp.lt.s32.totalorder %s1207_s25, %s892_s10 }
 0x19a   : > { %p895_p2 = scmp.lt.s32.totalorder %s893_s0, %s887_s16 }
 0x19c   : > { %p896_p3 = por %p895_p2, %p894_p1 }
 0x19e   : > { %p897_p5 = pnand %p896_p3, %p890_p0 }
 0x1a0   : > { %900 = shalt.err (!%p897_p5)
}
 0x1a1   : > { %s901_s29 = scalar_lea.hbm %s1205_s17, 16  ;;  %s905_s30 = scalar_lea.hbm %s1325_s3, 32 }
 0x1a2   : > { %p902_p6 = scmp.ne.s32.totalorder %s1205_s17, %s901_s29  ;;  %p906_p13 = scmp.lt.s32.totalorder %s1205_s17, %s1325_s3 }
 0x1a3   : > { %p907_p4 = scmp.lt.s32.totalorder %s905_s30, %s901_s29 }
 0x1a4   : > { %p903_p7 = pnand %p902_p6, %p1119_p9 }
 0x1a5   : > { %p908_p8 = por %p907_p4, %p906_p13 }
 0x1a6   : > { %p904_p10 = pneg %p903_p7 }
 0x1a8   : > { %p909_p0 = pnand %p908_p8, %p904_p10 }
 0x1aa   : > { %912 = shalt.err (!%p909_p0)
}
 0x1ab   : > { %774 = dma.vmem_to_hbm [thread:$0]  (%p1119_p9), %s1207_s25, 16, %s1205_s17, %s553_s14  }
 0x1ac   : > { %s1240_s0 = spop %770  ;;  %s1246_s29 = scalar_lea.hbm %s1327_s5, %s1194_s11 }
 0x1ad   : > { %v550_v51 = vstv %s1240_s0  ;;  %s1338_s26 = sand.u32 1, %s1095_s24   ;;  %s913_s30 = scalar_lea.vmem %s1217_s9, 16 }
 0x1ae   : > { %s1251_s21 = scalar_lea.sflag [#allocation11], %s1338_s26  ;;  %p914_p1 = scmp.ne.s32.totalorder %s1217_s9, %s913_s30 }
 0x1af   : > { %s1032_s12 = smov [#allocation10]  }
 0x1b0   : > { %p915_p2 = pnand %p914_p1, %p1119_p9  ;;  %s917_s27 = sshll.u32 %s1032_s12, 4  ;;  %s918_s27 = int_to_ptr.vmem [resolvable:$false] %s917_s27 }
 0x1b1   : > { %s919_s25 = scalar_lea.vmem %s918_s27, 32  ;;  %p920_p5 = scmp.lt.s32.totalorder %s1217_s9, %s918_s27 }
 0x1b2   : > { %p916_p3 = pneg %p915_p2  ;;  %p921_p6 = scmp.lt.s32.totalorder %s919_s25, %s913_s30 }
 0x1b4   : > { %p922_p7 = por %p921_p6, %p920_p5 }
 0x1b6   : > { %p923_p10 = pnand %p922_p7, %p916_p3 }
 0x1b8   : > { %926 = shalt.err (!%p923_p10)
}
 0x1b9   : > { %s927_s24 = scalar_lea.hbm %s1215_s13, 16  ;;  %s931_s14 = scalar_lea.hbm %s1326_s4, 32 }
 0x1ba   : > { %p928_p13 = scmp.ne.s32.totalorder %s1215_s13, %s927_s24  ;;  %p932_p0 = scmp.lt.s32.totalorder %s1215_s13, %s1326_s4 }
 0x1bb   : > { %p933_p1 = scmp.lt.s32.totalorder %s931_s14, %s927_s24 }
 0x1bc   : > { %p929_p4 = pnand %p928_p13, %p1119_p9 }
 0x1bd   : > { %p934_p2 = por %p933_p1, %p932_p0 }
 0x1be   : > { %p930_p8 = pneg %p929_p4 }
 0x1c0   : > { %p935_p3 = pnand %p934_p2, %p930_p8 }
 0x1c2   : > { %938 = shalt.err (!%p935_p3)
}
 0x1c3   : > { %775 = dma.vmem_to_hbm [thread:$0]  (%p1119_p9), %s1217_s9, 16, %s1215_s13, %s1251_s21  }
 0x1c4   : > { %s1339_s16 = scalar_lea.vmem [#allocation12], %s1158_s28  ;;  %s939_s26 = scalar_lea.vmem %s1209_s15, 16 }
 0x1c5   : > { %551 = vst [vmem:[%s1339_s16] sm:$0x1] %v550_v51  ;;  %p940_p5 = scmp.ne.s32.totalorder %s1209_s15, %s939_s26  ;;  %s1033_s30 = smov [#allocation12]  }
 0x1c6   : > { %s943_s12 = sshll.u32 %s1033_s30, 4  ;;  %s944_s12 = int_to_ptr.vmem [resolvable:$false] %s943_s12 }
 0x1c7   : > { %p941_p6 = pnand %p940_p5, %p1119_p9  ;;  %s945_s27 = scalar_lea.vmem %s944_s12, 32 }
 0x1c8   : > { %p946_p10 = scmp.lt.s32.totalorder %s1209_s15, %s944_s12  ;;  %p947_p13 = scmp.lt.s32.totalorder %s945_s27, %s939_s26 }
 0x1c9   : > { %p942_p7 = pneg %p941_p6 }
 0x1ca   : > { %p948_p4 = por %p947_p13, %p946_p10 }
 0x1cc   : > { %p949_p8 = pnand %p948_p4, %p942_p7 }
 0x1ce   : > { %952 = shalt.err (!%p949_p8)
}
 0x1cf   : > { %s953_s28 = scalar_lea.hbm %s1246_s29, 16  ;;  %s957_s25 = scalar_lea.hbm %s1327_s5, 32 }
 0x1d0   : > { %p954_p0 = scmp.ne.s32.totalorder %s1246_s29, %s953_s28  ;;  %p958_p3 = scmp.lt.s32.totalorder %s1246_s29, %s1327_s5 }
 0x1d1   : > { %p959_p5 = scmp.lt.s32.totalorder %s957_s25, %s953_s28 }
 0x1d2   : > { %p955_p1 = pnand %p954_p0, %p1119_p9 }
 0x1d3   : > { %p960_p6 = por %p959_p5, %p958_p3 }
 0x1d4   : > { %p956_p2 = pneg %p955_p1 }
 0x1d6   : > { %p961_p7 = pnand %p960_p6, %p956_p2 }
 0x1d8   : > { %964 = shalt.err (!%p961_p7)
}
 0x1d9   : > { %776 = dma.vmem_to_hbm [thread:$0]  (%p1119_p9), %s1209_s15, 16, %s1246_s29, %s1251_s21  }
 0x1da PF: > { %s611_s17 = sand.u32 1, %s1003_s18   ;;  %p781_p10 = pnand %p748_p12, %p1128_p11 }
 0x1db   : > { %s612_s14 = scalar_lea.sflag [#allocation7], %s611_s17 }
 0x1dc   : > { %p782_p13 = pneg %p781_p10 }
 0x1de   : > { %994 = dma.done.wait (%p782_p13), %s612_s14, 16  }
 0x1df   : > { %996 = vsyncadd (%p782_p13), %s612_s14, 4294967280  ;;  %s1340_s0 = sadd.s32 4294967294, %s1023_s23  }
 0x1e0   : > { %s619_s10 = sand.u32 1, %s1340_s0  }
 0x1e1   : > { %s620_s6 = scalar_lea.sflag [#allocation11], %s619_s10 }
 0x1e2   : > { %998 = dma.done.wait (%p782_p13), %s620_s6, 32  }
 0x1e3   : > { %1000 = vsyncadd (%p782_p13), %s620_s6, 4294967264  ;;  %s25_s23 = sadd.s32 1, %s1023_s23   ;;  %s1341_s8 = sld [smem:[#allocation16_spill]] }
 0x1e4   : > { %p22_p9 = scmp.ge.s32.totalorder %s25_s23, 4   ;;  %s1342_s18 = smov %s1007_s19 }
 0x1e5   : > { %s1343_s19 = smov %s1011_s20  ;;  %s1344_s20 = smov %s1126_s7 }
 0x1e6   : > { %s1345_s21 = smov %s1019_s22  ;;  %24 = sbr.rel (!%p22_p9) target bundleno = 10 (0xa), region = 159 }
 0x1e9   : > { %s1346_s22 = smov %s1341_s8 }
 0x1eb   :  { %632 = vsyncpa [#allocation6], 1 }
 0x1ec   :  { %634 = vsyncpa [#allocation6 + $0x1], 1 }
 0x1ed   :  { %635 = vsyncpa [#allocation7], 1 }
 0x1ee   :  { %637 = vsyncpa [#allocation7 + $0x1], 1 }
 0x1ef   :  { %638 = vsyncpa [#allocation11], 1 }
 0x1f0   :  { %640 = vsyncpa [#allocation11 + $0x1], 1 }

</bundles_post_ra>
